<compile_context>
chip_gen: v7x
topology: tpu7x:2x2x1
jax: 0.10.0
libtpu: 0.0.40
codegen_flags: <defaults>
</compile_context>

<pallas_src>
import functools

import jax
import jax.numpy as jnp
from jax.experimental import pallas as pl
from jax.experimental.pallas import tpu as pltpu

NUM_CLASSES = 5


def _ce_kernel(w_ref, q_ref, lbl_ref, out_ref, *, num_classes):
    """One grid step processes a (1, C, tile_s, 128) probability block.

    w_ref   : (C, 128)            f32 per-class weights (row-broadcast)
    q_ref   : (1, C, tile_s, 128) f32 class probabilities
    lbl_ref : (1, tile_s, 128)    i32 class labels
    out_ref : (1, 8, 128)         f32 per-batch partial sums (accumulator,
                                  resident across the tile axis)
    """
    t = pl.program_id(1)

    @pl.when(t == 0)
    def _init():
        out_ref[...] = jnp.zeros_like(out_ref)

    lbl = lbl_ref[0]                                    # (tile_s, 128)

    # Select the label-channel probability and weight (exactly one class
    # matches per pixel) BEFORE taking the log.
    q_sel = jnp.zeros(lbl.shape, jnp.float32)
    w_sel = jnp.zeros(lbl.shape, jnp.float32)
    for c in range(num_classes):                        # C is tiny & static
        m = lbl == c
        q_sel = jnp.where(m, q_ref[0, c], q_sel)
        w_sel = jnp.where(m, w_ref[c], w_sel)

    contrib = w_sel * jnp.log(q_sel)                    # log on 1/C elements

    # Reduce the tile to an (8, 128) partial and accumulate element-wise.
    s, lanes = contrib.shape
    pad = (-s) % 8
    if pad:  # small-tile fallback (only when tile_s < 8 / not 8-aligned)
        contrib = jnp.concatenate(
            [contrib, jnp.zeros((pad, lanes), jnp.float32)], axis=0)
    part = contrib.reshape(-1, 8, lanes).sum(axis=0)    # (8, 128)
    out_ref[...] += part[None]


def _choose_tile_s(s_total, c_dim, target_block_bytes=1 << 20):
    """Pick tile_s (rows of 128 pixels) so the q block is ~1 MB and the
    block shape satisfies the (8, 128) tiling rule."""
    row_bytes = c_dim * 128 * 4  # one sublane-row of the f32 q block
    max_rows = max(8, target_block_bytes // row_bytes)
    if s_total <= max_rows:
        return s_total                                  # full extent: always legal
    candidates = [d for d in range(8, int(max_rows) + 1, 8) if s_total % d == 0]
    if candidates:
        return candidates[-1]
    # TODO(synk): pad H*W in the wrapper so an 8-aligned divisor always exists.
    return s_total


def cross_entropy_only_weight(G_img, inputs_b, weights, *,
                              target_block_bytes=1 << 20):
    """Pallas implementation of CrossEntropy_only_weight.forward."""
    N, C, H, W = G_img.shape
    HW = H * W
    assert HW % 128 == 0, "H*W must be a multiple of 128 (lane width)"
    # TODO(synk): masked remainder tile for H*W not a multiple of 128.
    s_total = HW // 128

    tile_s = _choose_tile_s(s_total, C, target_block_bytes)
    num_tiles = s_total // tile_s
    total_elems = N * C * HW

    # Lane-dense spatial layout: (..., S, 128) pixels.
    q = G_img.reshape(N, C, s_total, 128).astype(jnp.float32)
    lbl = inputs_b.reshape(N, s_total, 128).astype(jnp.int32)
    w = jnp.broadcast_to(weights.astype(jnp.float32)[:, None], (C, 128))

    kernel = functools.partial(_ce_kernel, num_classes=C)

    partials = pl.pallas_call(
        kernel,
        out_shape=jax.ShapeDtypeStruct((N, 8, 128), jnp.float32),
        grid_spec=pltpu.PrefetchScalarGridSpec(
            num_scalar_prefetch=0,
            grid=(N, num_tiles),
            in_specs=[
                pl.BlockSpec((C, 128), lambda b, t: (0, 0)),
                pl.BlockSpec((1, C, tile_s, 128), lambda b, t: (b, 0, t, 0)),
                pl.BlockSpec((1, tile_s, 128), lambda b, t: (b, t, 0)),
            ],
            out_specs=pl.BlockSpec((1, 8, 128), lambda b, t: (b, 0, 0)),
        ),
        compiler_params=pltpu.CompilerParams(
            dimension_semantics=("parallel", "arbitrary")),
    )(w, q, lbl)

    # Final cross-lane reduction, sign and mean happen in plain JAX.
    return -jnp.sum(partials) / total_elems


def _reference(G_img, inputs_b, weights):
    """Pure-JAX reference mirroring the PyTorch module exactly."""
    C = G_img.shape[1]
    p = jax.nn.one_hot(inputs_b, C, dtype=jnp.float32)          # (N, H, W, C)
    p = jnp.transpose(p, (0, 3, 1, 2))                          # (N, C, H, W)
    q = jnp.log(G_img)
    ans = weights.reshape(1, -1, 1, 1) * (p * q)
    return -jnp.mean(ans)


if __name__ == "__main__":
    key = jax.random.PRNGKey(0)
    k1, k2 = jax.random.split(key)

    N, C, H, W = 2, NUM_CLASSES, 16, 16

    # G_img: positive class probabilities (softmax over channel axis)
    logits = jax.random.normal(k1, (N, C, H, W), dtype=jnp.float32)
    G_img = jax.nn.softmax(logits, axis=1)

    # inputs_b: integer class labels
    inputs_b = jax.random.randint(k2, (N, H, W), 0, C, dtype=jnp.int32)

    # per-class weights (deterministic, synthetic)
    weights = jnp.array([0.5, 1.0, 1.5, 2.0, 2.5], dtype=jnp.float32)

    ce = cross_entropy_only_weight(G_img, inputs_b, weights)
    ce = jax.block_until_ready(ce)

    ref = _reference(G_img, inputs_b, weights)
    assert jnp.allclose(ce, ref, rtol=1e-5, atol=1e-6), (ce, ref)

    print("KERNEL_OK")
</pallas_src>

<mosaic_0001>
module attributes {stable_mosaic.version = 11 : i64} {
  func.func @_ce_kernel(%arg0: i32, %arg1: i32, %arg2: memref<5x128xf32, #tpu.memory_space<vmem>>, %arg3: memref<1x5x2x128xf32, #tpu.memory_space<vmem>>, %arg4: memref<1x2x128xi32, #tpu.memory_space<vmem>>, %arg5: memref<1x8x128xf32, #tpu.memory_space<vmem>>) attributes {dimension_semantics = [#tpu.dimension_semantics<parallel>, #tpu.dimension_semantics<arbitrary>], iteration_bounds = array<i64: 2, 1>, scalar_prefetch = 0 : i64, scratch_operands = 0 : i64, tpu.core_type = #tpu.core_type<tc>, window_params = [{pipeline_mode = #tpu.pipeline_mode<synchronous>, transform_indices = @transform_0, window_bounds = array<i64: 5, 128>}, {transform_indices = @transform_1, window_bounds = array<i64: 1, 5, 2, 128>}, {transform_indices = @transform_2, window_bounds = array<i64: 1, 2, 128>}, {transform_indices = @transform_3, window_bounds = array<i64: 1, 8, 128>}]} {
    %c0_i32 = arith.constant 0 : i32
    %0 = arith.cmpi eq, %arg1, %c0_i32 : i32
    %1 = arith.extui %0 : i1 to i32
    %c0_i32_0 = arith.constant 0 : i32
    %2 = arith.cmpi ne, %1, %c0_i32_0 : i32
    scf.if %2 {
      %cst_39 = arith.constant 0.000000e+00 : f32
      %67 = vector.broadcast %cst_39 : f32 to vector<1x8x128xf32>
      %c0_40 = arith.constant 0 : index
      %c0_41 = arith.constant 0 : index
      %c0_42 = arith.constant 0 : index
      %68 = vector.load %arg5[%c0_40, %c0_41, %c0_42] : memref<1x8x128xf32, #tpu.memory_space<vmem>>, vector<1x8x128xf32>
      tpu.vector_store %arg5[%c0_40, %c0_41, %c0_42], %67 {strides = array<i32>} : memref<1x8x128xf32, #tpu.memory_space<vmem>>, vector<1x8x128xf32>,
    } else {
    }
    %c0 = arith.constant 0 : index
    %c0_1 = arith.constant 0 : index
    %c0_2 = arith.constant 0 : index
    %3 = vector.load %arg4[%c0, %c0_1, %c0_2] : memref<1x2x128xi32, #tpu.memory_space<vmem>>, vector<1x2x128xi32>
    %4 = vector.shape_cast %3 : vector<1x2x128xi32> to vector<2x128xi32>
    %cst = arith.constant 0.000000e+00 : f32
    %5 = vector.broadcast %cst : f32 to vector<2x128xf32>
    %cst_3 = arith.constant 0.000000e+00 : f32
    %6 = vector.broadcast %cst_3 : f32 to vector<2x128xf32>
    %c0_i32_4 = arith.constant 0 : i32
    %7 = vector.broadcast %c0_i32_4 : i32 to vector<2x128xi32>
    %8 = arith.cmpi eq, %4, %7 : vector<2x128xi32>
    %c0_5 = arith.constant 0 : index
    %c0_6 = arith.constant 0 : index
    %c0_7 = arith.constant 0 : index
    %c0_8 = arith.constant 0 : index
    %9 = vector.load %arg3[%c0_5, %c0_6, %c0_7, %c0_8] : memref<1x5x2x128xf32, #tpu.memory_space<vmem>>, vector<1x1x2x128xf32>
    %10 = vector.shape_cast %9 : vector<1x1x2x128xf32> to vector<2x128xf32>
    %11 = arith.select %8, %10, %5 : vector<2x128xi1>, vector<2x128xf32>
    %c0_9 = arith.constant 0 : index
    %c0_10 = arith.constant 0 : index
    %12 = vector.load %arg2[%c0_9, %c0_10] : memref<5x128xf32, #tpu.memory_space<vmem>>, vector<1x128xf32>
    %13 = vector.shape_cast %12 : vector<1x128xf32> to vector<128xf32>
    %14 = vector.shape_cast %13 : vector<128xf32> to vector<1x128xf32>
    %15 = vector.broadcast %14 : vector<1x128xf32> to vector<2x128xf32>
    %16 = arith.select %8, %15, %6 : vector<2x128xi1>, vector<2x128xf32>
    %c1_i32 = arith.constant 1 : i32
    %17 = vector.broadcast %c1_i32 : i32 to vector<2x128xi32>
    %18 = arith.cmpi eq, %4, %17 : vector<2x128xi32>
    %c0_11 = arith.constant 0 : index
    %c1 = arith.constant 1 : index
    %c0_12 = arith.constant 0 : index
    %c0_13 = arith.constant 0 : index
    %19 = vector.load %arg3[%c0_11, %c1, %c0_12, %c0_13] : memref<1x5x2x128xf32, #tpu.memory_space<vmem>>, vector<1x1x2x128xf32>
    %20 = vector.shape_cast %19 : vector<1x1x2x128xf32> to vector<2x128xf32>
    %21 = arith.select %18, %20, %11 : vector<2x128xi1>, vector<2x128xf32>
    %c1_14 = arith.constant 1 : index
    %c0_15 = arith.constant 0 : index
    %22 = vector.load %arg2[%c1_14, %c0_15] : memref<5x128xf32, #tpu.memory_space<vmem>>, vector<1x128xf32>
    %23 = vector.shape_cast %22 : vector<1x128xf32> to vector<128xf32>
    %24 = vector.shape_cast %23 : vector<128xf32> to vector<1x128xf32>
    %25 = vector.broadcast %24 : vector<1x128xf32> to vector<2x128xf32>
    %26 = arith.select %18, %25, %16 : vector<2x128xi1>, vector<2x128xf32>
    %c2_i32 = arith.constant 2 : i32
    %27 = vector.broadcast %c2_i32 : i32 to vector<2x128xi32>
    %28 = arith.cmpi eq, %4, %27 : vector<2x128xi32>
    %c0_16 = arith.constant 0 : index
    %c2 = arith.constant 2 : index
    %c0_17 = arith.constant 0 : index
    %c0_18 = arith.constant 0 : index
    %29 = vector.load %arg3[%c0_16, %c2, %c0_17, %c0_18] : memref<1x5x2x128xf32, #tpu.memory_space<vmem>>, vector<1x1x2x128xf32>
    %30 = vector.shape_cast %29 : vector<1x1x2x128xf32> to vector<2x128xf32>
    %31 = arith.select %28, %30, %21 : vector<2x128xi1>, vector<2x128xf32>
    %c2_19 = arith.constant 2 : index
    %c0_20 = arith.constant 0 : index
    %32 = vector.load %arg2[%c2_19, %c0_20] : memref<5x128xf32, #tpu.memory_space<vmem>>, vector<1x128xf32>
    %33 = vector.shape_cast %32 : vector<1x128xf32> to vector<128xf32>
    %34 = vector.shape_cast %33 : vector<128xf32> to vector<1x128xf32>
    %35 = vector.broadcast %34 : vector<1x128xf32> to vector<2x128xf32>
    %36 = arith.select %28, %35, %26 : vector<2x128xi1>, vector<2x128xf32>
    %c3_i32 = arith.constant 3 : i32
    %37 = vector.broadcast %c3_i32 : i32 to vector<2x128xi32>
    %38 = arith.cmpi eq, %4, %37 : vector<2x128xi32>
    %c0_21 = arith.constant 0 : index
    %c3 = arith.constant 3 : index
    %c0_22 = arith.constant 0 : index
    %c0_23 = arith.constant 0 : index
    %39 = vector.load %arg3[%c0_21, %c3, %c0_22, %c0_23] : memref<1x5x2x128xf32, #tpu.memory_space<vmem>>, vector<1x1x2x128xf32>
    %40 = vector.shape_cast %39 : vector<1x1x2x128xf32> to vector<2x128xf32>
    %41 = arith.select %38, %40, %31 : vector<2x128xi1>, vector<2x128xf32>
    %c3_24 = arith.constant 3 : index
    %c0_25 = arith.constant 0 : index
    %42 = vector.load %arg2[%c3_24, %c0_25] : memref<5x128xf32, #tpu.memory_space<vmem>>, vector<1x128xf32>
    %43 = vector.shape_cast %42 : vector<1x128xf32> to vector<128xf32>
    %44 = vector.shape_cast %43 : vector<128xf32> to vector<1x128xf32>
    %45 = vector.broadcast %44 : vector<1x128xf32> to vector<2x128xf32>
    %46 = arith.select %38, %45, %36 : vector<2x128xi1>, vector<2x128xf32>
    %c4_i32 = arith.constant 4 : i32
    %47 = vector.broadcast %c4_i32 : i32 to vector<2x128xi32>
    %48 = arith.cmpi eq, %4, %47 : vector<2x128xi32>
    %c0_26 = arith.constant 0 : index
    %c4 = arith.constant 4 : index
    %c0_27 = arith.constant 0 : index
    %c0_28 = arith.constant 0 : index
    %49 = vector.load %arg3[%c0_26, %c4, %c0_27, %c0_28] : memref<1x5x2x128xf32, #tpu.memory_space<vmem>>, vector<1x1x2x128xf32>
    %50 = vector.shape_cast %49 : vector<1x1x2x128xf32> to vector<2x128xf32>
    %51 = arith.select %48, %50, %41 : vector<2x128xi1>, vector<2x128xf32>
    %c4_29 = arith.constant 4 : index
    %c0_30 = arith.constant 0 : index
    %52 = vector.load %arg2[%c4_29, %c0_30] : memref<5x128xf32, #tpu.memory_space<vmem>>, vector<1x128xf32>
    %53 = vector.shape_cast %52 : vector<1x128xf32> to vector<128xf32>
    %54 = vector.shape_cast %53 : vector<128xf32> to vector<1x128xf32>
    %55 = vector.broadcast %54 : vector<1x128xf32> to vector<2x128xf32>
    %56 = arith.select %48, %55, %46 : vector<2x128xi1>, vector<2x128xf32>
    %57 = math.log %51 : vector<2x128xf32>
    %58 = arith.mulf %56, %57 : vector<2x128xf32>
    %cst_31 = arith.constant 0.000000e+00 : f32
    %59 = vector.broadcast %cst_31 : f32 to vector<6x128xf32>
    %60 = tpu.concatenate %58, %59 in 0 : vector<2x128xf32>, vector<6x128xf32> -> vector<8x128xf32>
    %61 = vector.shape_cast %60 : vector<8x128xf32> to vector<1x8x128xf32>
    %cst_32 = arith.constant dense<0.000000e+00> : vector<8x128xf32>
    %62 = vector.multi_reduction <add>, %61, %cst_32 [0] : vector<1x8x128xf32> to vector<8x128xf32>
    %c0_33 = arith.constant 0 : index
    %c0_34 = arith.constant 0 : index
    %c0_35 = arith.constant 0 : index
    %63 = vector.load %arg5[%c0_33, %c0_34, %c0_35] : memref<1x8x128xf32, #tpu.memory_space<vmem>>, vector<1x8x128xf32>
    %64 = vector.shape_cast %62 : vector<8x128xf32> to vector<1x8x128xf32>
    %65 = arith.addf %63, %64 : vector<1x8x128xf32>
    %c0_36 = arith.constant 0 : index
    %c0_37 = arith.constant 0 : index
    %c0_38 = arith.constant 0 : index
    %66 = vector.load %arg5[%c0_36, %c0_37, %c0_38] : memref<1x8x128xf32, #tpu.memory_space<vmem>>, vector<1x8x128xf32>
    tpu.vector_store %arg5[%c0_36, %c0_37, %c0_38], %65 {strides = array<i32>} : memref<1x8x128xf32, #tpu.memory_space<vmem>>, vector<1x8x128xf32>,
    return
  }
  func.func @transform_0(%arg0: i32, %arg1: i32) -> (i32, i32) {
    %c0_i32 = arith.constant 0 : i32
    %c0_i32_0 = arith.constant 0 : i32
    %c0_i32_1 = arith.constant 0 : i32
    return %c0_i32, %c0_i32_0 : i32, i32
  }
  func.func @transform_1(%arg0: i32, %arg1: i32) -> (i32, i32, i32, i32) {
    %c0_i32 = arith.constant 0 : i32
    %c0_i32_0 = arith.constant 0 : i32
    %c0_i32_1 = arith.constant 0 : i32
    return %arg0, %c0_i32, %arg1, %c0_i32_0 : i32, i32, i32, i32
  }
  func.func @transform_2(%arg0: i32, %arg1: i32) -> (i32, i32, i32) {
    %c0_i32 = arith.constant 0 : i32
    %c0_i32_0 = arith.constant 0 : i32
    return %arg0, %arg1, %c0_i32 : i32, i32, i32
  }
  func.func @transform_3(%arg0: i32, %arg1: i32) -> (i32, i32, i32) {
    %c0_i32 = arith.constant 0 : i32
    %c0_i32_0 = arith.constant 0 : i32
    %c0_i32_1 = arith.constant 0 : i32
    return %arg0, %c0_i32, %c0_i32_0 : i32, i32, i32
  }
}

</mosaic_0001>

<bundles_post_ra>
// kernel: tpu_custom_call.1
= control target key start
LH: loop header
LB: loop body
LE: loop exit
PB: predicated region body
PF: predicated region fallthrough
CT: control target
= control target key end

     0   :  { %8 = vsyncpa [#allocation3], 0  ;;  %s934_s0 = inlined_call_operand.hbm [shape: f32[5,128], index: 0, kind: input, shape index: {}]   ;;  %s935_s1 = inlined_call_operand.hbm [shape: f32[2,5,2,128], index: 1, kind: input, shape index: {}]   ;;  %s936_s2 = inlined_call_operand.vmem [shape: s32[2,2,128], index: 2, kind: input, shape index: {}]   ;;  %s937_s3 = inlined_call_operand.hbm [shape: f32[2,8,128], index: 3, kind: output, shape index: {}]  }
   0x1   :  { %9 = vsyncpa [#allocation6], 0 }
   0x2   :  { %11 = vsyncpa [#allocation6 + $0x1], 0 }
   0x3   :  { %12 = vsyncpa [#allocation4], 0 }
   0x4   :  { %14 = vsyncpa [#allocation4 + $0x1], 0  ;;  %s705_s12 = smov 0   ;;  %s707_s13 = smov 0  }
   0x5   :  { %s709_s14 = smov 0   ;;  %s711_s15 = smov 0  }
   0x6   :  { %s713_s16 = smov 0   ;;  %s715_s17 = smov 0  }
   0x7 LB: > { %s430_s18 = sadd.s32 4294967295, %s678_s17   ;;  %s431_s19 = sadd.s32 4294967294, %s678_s17   ;;  %s678_s17 = sphi %s715_s17, %s20_s17   ;;  %s674_s16 = sphi %s713_s16, %s965_s16   ;;  %s670_s15 = sphi %s711_s15, %s964_s15   ;;  %s666_s14 = sphi %s709_s14, %s963_s14   ;;  %s662_s13 = sphi %s707_s13, %s962_s13   ;;  %s658_s12 = sphi %s705_s12, %s961_s12  }
   0x8   : > { %s62_s20 = sadd.s32 1, %s666_s14  ;;  %p69_p0 = scmp.ne.s32.totalorder %s666_s14, %s662_s13 }
   0x9   : > { %p70_p1 = scmp.eq.s32.totalorder %s678_s17, 0  ;;  %p75_p2 = scmp.ne.s32.totalorder %s662_s13, %s658_s12 }
   0xa   : > { %p743_p3 = scmp.eq.s32.totalorder %s430_s18, 0  ;;  %p127_p4 = scmp.eq.s32.totalorder %s430_s18, 1 }
   0xb   : > { %p747_p5 = por %p70_p1, %p69_p0  ;;  %p133_p6 = scmp.eq.s32.totalorder %s431_s19, 1 }
   0xc   : > { %s944_s21 = scalar_select %p743_p3, 1, 0 }
   0xd   : > { %p753_p7 = por %p743_p3, %p75_p2  ;;  %p757_p8 = por %p127_p4, %p69_p0 }
   0xe   : > { %p761_p9 = por %p133_p6, %p75_p2  ;;  %p432_p10 = scmp.ge.s32.totalorder %s678_s17, 1 }
   0xf   : > { %s946_s23 = scalar_select %p753_p7, 1, 0 }
  0x10   : > { %s947_s24 = scalar_select %p757_p8, 1, 0 }
  0x11   : > { %s948_s25 = scalar_select %p761_p9, 1, 0 }
  0x12   : > { %p140_p11 = scmp.lt.s32.totalorder %s678_s17, 3  ;;  %s680_s27 = smov [#allocation2]  }
  0x13   : > { %s153_s28 = sshll.u32 %s680_s27, 4  ;;  %p477_p1 = scmp.lt.s32.totalorder %s678_s17, 2  ;;  %s154_s28 = int_to_ptr.vmem [resolvable:$true] %s153_s28 }
  0x14   : > { %p768_p13 = pnand %p432_p10, %p140_p11  ;;  %s32_s4 = sadd.s32 1, %s674_s16 }
  0x15   : > { %p777_p4 = pnand %p477_p1, %p747_p5  ;;  %p788_p6 = scmp.ge.s32.totalorder %s32_s4, 2 }
  0x16   : > { %s949_s26 = scalar_select %p768_p13, 1, 0 }
  0x17   : > { %p464_p0 = pneg %p768_p13  ;;  %s164_s6 = sand.u32 1, %s666_s14  }
  0x18   : > { %s950_s29 = scalar_select %p777_p4, 1, 0 }
  0x19   : > { %p783_p2 = pnand %p464_p0, %p743_p3  ;;  %s534_s9 = scalar_lea.hbm %s934_s0, 128 }
  0x1a   : > { %s952_s5 = scalar_select %p788_p6, 1, 0 }
  0x1b   : > { %p535_p5 = scmp.ne.s32.totalorder %s934_s0, %s534_s9  ;;  %p536_p10 = pneg %p783_p2 }
  0x1c   : > { %p541_p0 = scmp.lt.u32.totalorder %s534_s9, %s934_s0 }
  0x1d   : > { %p537_p11 = pnand %p536_p10, %p535_p5 }
  0x1f   : > { %p538_p1 = pneg %p537_p11 }
  0x21   : > { %p543_p12 = pnand %p541_p0, %p538_p1 }
  0x23   : > { %546 = shalt.err (!%p543_p12)
}
  0x24   : > { %s547_s22 = scalar_lea.vmem %s154_s28, 128  ;;  %p555_p3 = scmp.lt.s32.totalorder %s154_s28, %s154_s28 }
  0x25   : > { %p548_p9 = scmp.ne.s32.totalorder %s154_s28, %s547_s22  ;;  %p556_p13 = scmp.lt.s32.totalorder %s547_s22, %s547_s22 }
  0x27   : > { %p550_p8 = pnand %p548_p9, %p536_p10  ;;  %p557_p4 = por %p556_p13, %p555_p3 }
  0x29   : > { %p551_p7 = pneg %p550_p8 }
  0x2b   : > { %p558_p6 = pnand %p557_p4, %p551_p7 }
  0x2d   : > { %561 = shalt.err (!%p558_p6)
}
  0x2e   : > { %467 = dma.hbm_to_vmem [thread:$0]  (!%p783_p2), %s934_s0, 128, %s154_s28, [#allocation3]  }
  0x2f   : > { %p953_p9 = scmp.ne.s32.totalorder %s952_s5, 0  ;;  %s453_s8 = smul.u32 10, %s164_s6 }
  0x30   : > { %s454_s10 = smul.u32 160, %s674_s16  ;;  %s828_s5 = scalar_lea.sflag [#allocation6], %s164_s6 }
  0x31   : > { %s967_s4 = smov (%p953_p9, %s32_s4), 0  ;;  %s168_s19 = scalar_lea.vmem [#allocation5], %s453_s8 }
  0x32   : > { %s57_s9 = ssub.s32 %s674_s16, %s967_s4  ;;  %s819_s18 = scalar_lea.hbm %s935_s1, %s454_s10 }
  0x33   : > { %p60_p3 = scmp.eq.s32.totalorder %s57_s9, 0  ;;  %s176_s22 = sshll.u32 %s168_s19, 4  ;;  %s826_s22 = int_to_ptr.vmem [resolvable:$true] %s176_s22 }
  0x34   : > { %s562_s27 = scalar_lea.hbm %s819_s18, 160  ;;  %p954_p8 = scmp.ne.s32.totalorder %s950_s29, 0 }
  0x35   : > { %s824_s28 = scalar_select %p60_p3, %s666_s14, %s62_s20  }
  0x36   : > { %p563_p7 = scmp.ne.s32.totalorder %s819_s18, %s562_s27  ;;  %p564_p12 = pneg %p954_p8 }
  0x37   : > { %s567_s8 = scalar_lea.hbm %s935_s1, 320  ;;  %p568_p2 = scmp.lt.u32.totalorder %s819_s18, %s935_s1 }
  0x38   : > { %p565_p13 = pnand %p564_p12, %p563_p7  ;;  %p569_p6 = scmp.lt.u32.totalorder %s567_s8, %s562_s27 }
  0x39   : > { %p571_p10 = scmp.lt.u32.totalorder %s562_s27, %s819_s18 }
  0x3a   : > { %p566_p4 = pneg %p565_p13  ;;  %p570_p5 = por %p569_p6, %p568_p2 }
  0x3c   : > { %p572_p11 = por %p571_p10, %p570_p5 }
  0x3e   : > { %p573_p1 = pnand %p572_p11, %p566_p4 }
  0x40   : > { %576 = shalt.err (!%p573_p1)
}
  0x41   : > { %s577_s20 = scalar_lea.vmem %s826_s22, 160  ;;  %s681_s6 = smov [#allocation5]  }
  0x42   : > { %p578_p0 = scmp.ne.s32.totalorder %s826_s22, %s577_s20  ;;  %s582_s11 = sshll.u32 %s681_s6, 4  ;;  %s583_s11 = int_to_ptr.vmem [resolvable:$false] %s582_s11 }
  0x43   : > { %s584_s19 = scalar_lea.vmem %s583_s11, 320  ;;  %p585_p7 = scmp.lt.s32.totalorder %s826_s22, %s583_s11 }
  0x44   : > { %p580_p9 = pnand %p578_p0, %p564_p12  ;;  %p586_p13 = scmp.lt.s32.totalorder %s584_s19, %s577_s20 }
  0x46   : > { %p581_p3 = pneg %p580_p9  ;;  %p587_p2 = por %p586_p13, %p585_p7 }
  0x48   : > { %p588_p6 = pnand %p587_p2, %p581_p3 }
  0x4a   : > { %591 = shalt.err (!%p588_p6)
}
  0x4b   : > { %s682_s27 = smov 32   ;;  %s683_s7 = smov 2  }
  0x4c   : > { %471 = dma.hbm_to_vmem [thread:$0]  (!%p954_p8), %s819_s18, 160, %s826_s22, %s828_s5, %s682_s27, %s682_s27, %s683_s7  }
  0x4d   : > { %p955_p12 = scmp.ne.s32.totalorder %s949_s26, 0 }
  0x4e   : > { %p956_p4 = scmp.ne.s32.totalorder (!%p955_p12), %s944_s21, 0 }
  0x4f   : > { %198 = sbr.rel (%p955_p12) target bundleno = 135 (0x87), region = 32 }
  0x56   : > { %645 = dma.done.wait (%p956_p4), [#allocation3], 128  }
  0x57   : > { %647 = vsyncadd (%p956_p4), [#allocation3], 4294967168  ;;  %s863_s9 = sand.u32 1, %s662_s13   ;;  %p957_p5 = scmp.ne.s32.totalorder %s946_s23, 0 }
  0x58   : > { %s455_s8 = smul.u32 10, %s863_s9  ;;  %s205_s10 = scalar_lea.sflag [#allocation6], %s863_s9 }
  0x5a   : > { %s208_s30 = scalar_lea.vmem [#allocation5], %s455_s8 }
  0x5b   : > { %649 = dma.done.wait (%p957_p5), %s205_s10, 160  }
  0x5c   : > { %651 = vsyncadd (%p957_p5), %s205_s10, 4294967136  ;;  %p238_p8 = scmp.lt.s32.totalorder %s670_s15, 1  ;;  %v252_v1 = vld [vmem:[%s208_s30] sm:$0x3]  ;;  %v440_v2 = vld [vmem:[#allocation2] ss:$0 sm:$0xff] }
  0x5d   : > { %v441_v3 = vld [vmem:[%s208_s30 + $0x2] sm:$0x3]  ;;  %v443_v5 = vld [vmem:[%s208_s30 + $0x4] sm:$0x3]  ;;  %v445_v7 = vld [vmem:[%s208_s30 + $0x6] sm:$0x3] }
  0x5e   : > { %s239_s26 = scalar_select %p238_p8, %s670_s15, 1  ;;  %v447_v9 = vld [vmem:[%s208_s30 + $0x8] sm:$0x3]  ;;  %v442_v11 = vld [vmem:[#allocation2 + $0x1] ss:$0 sm:$0xff]  ;;  %vm303_vm5 = vcmask 1041408  }
  0x5f   : > { %v444_v15 = vld [vmem:[#allocation2 + $0x2] ss:$0 sm:$0xff]  ;;  %v446_v17 = vld [vmem:[#allocation2 + $0x3] ss:$0 sm:$0xff]  ;;  %s438_s23 = sshll.u32 %s863_s9, 3  ;;  %s450_s5 = sshll.u32 %s670_s15, 7 }
  0x60   : > { %s439_s21 = sshll.u32 %s239_s26, 1  ;;  %v448_v19 = vld [vmem:[#allocation2 + $0x4] ss:$0 sm:$0xff]  ;;  %s237_s20 = scalar_lea.vmem [#allocation7], %s438_s23 }
  0x61   : > { %s244_s22 = scalar_lea.vmem %s936_s2, %s439_s21  ;;  %s323_s6 = sshll.u32 %s237_s20, 4  ;;  %s887_s6 = int_to_ptr.vmem [resolvable:$true] %s323_s6 }
  0x62   : > { %v250_v0 = vld [vmem:[%s244_s22] sm:$0x3]  ;;  %s885_s27 = scalar_lea.hbm %s937_s3, %s450_s5  ;;  %s310_s7 = scalar_lea.sflag [#allocation4], %s863_s9 }
  0x63   : > { %vm251_vm0 = vcmp.eq.s32.totalorder %v250_v0, 0  ;;  %vm260_vm1 = vcmp.eq.s32.totalorder %v250_v0, 1  ;;  %vm270_vm2 = vcmp.eq.s32.totalorder %v250_v0, 2  ;;  %vm280_vm3 = vcmp.eq.s32.totalorder %v250_v0, 3  ;;  %s592_s8 = scalar_lea.vmem %s887_s6, 128  ;;  %p958_p11 = scmp.ne.s32.totalorder %s947_s24, 0 }
  0x64   : > { %v253_v4 = vsel %vm251_vm0, %v252_v1, 0.0  ;;  %vm290_vm4 = vcmp.eq.s32.totalorder %v250_v0, 4  ;;  %v259_v10 = vsel %vm251_vm0, %v440_v2, 0.0  ;;  %p593_p10 = scmp.ne.s32.totalorder %s887_s6, %s592_s8  ;;  %s684_s15 = smov [#allocation7]  }
  0x65   : > { %v263_v6 = vsel %vm260_vm1, %v441_v3, %v253_v4  ;;  %v269_v14 = vsel %vm260_vm1, %v442_v11, %v259_v10  ;;  %s596_s10 = sshll.u32 %s684_s15, 4  ;;  %s597_s10 = int_to_ptr.vmem [resolvable:$false] %s596_s10 }
  0x66   : > { %v273_v8 = vsel %vm270_vm2, %v443_v5, %v263_v6  ;;  %v279_v16 = vsel %vm270_vm2, %v444_v15, %v269_v14  ;;  %p594_p1 = pnand %p593_p10, %p958_p11  ;;  %s598_s30 = scalar_lea.vmem %s597_s10, 256 }
  0x67   : > { %v283_v12 = vsel %vm280_vm3, %v445_v7, %v273_v8  ;;  %v289_v18 = vsel %vm280_vm3, %v446_v17, %v279_v16  ;;  %p599_p9 = scmp.lt.s32.totalorder %s887_s6, %s597_s10  ;;  %p600_p3 = scmp.lt.s32.totalorder %s598_s30, %s592_s8 }
  0x68   : > { %v293_v13 = vsel %vm290_vm4, %v447_v9, %v283_v12  ;;  %v299_v21 = vsel %vm290_vm4, %v448_v19, %v289_v18  ;;  %p595_p0 = pneg %p594_p1 }
  0x69   : > { %532 = vlog2.f32 %v293_v13  ;;  %p601_p7 = por %p600_p3, %p599_p9 }
  0x6b   : > { %p602_p13 = pnand %p601_p7, %p595_p0 }
  0x73   : > { %v533_v20 = vpop.eup %532 }
  0x74   : > { %v301_v22 = vmul.f32 0.6931472, %v533_v20 }
  0x76   : > { %v302_v23 = vmul.f32 %v301_v22, %v299_v21 }
  0x78   : > { %v304_v24 = vsel %vm303_vm5, %v302_v23, 0.0 }
  0x79   : > { %308 = vst [vmem:[%s237_s20] sm:$0xff] %v304_v24 }
  0x7a   : > { %605 = shalt.err (!%p602_p13)
}
  0x7b   : > { %s606_s9 = scalar_lea.hbm %s885_s27, 128  ;;  %s610_s29 = scalar_lea.hbm %s937_s3, 256 }
  0x7c   : > { %p607_p2 = scmp.ne.s32.totalorder %s885_s27, %s606_s9  ;;  %p611_p4 = scmp.lt.u32.totalorder %s885_s27, %s937_s3 }
  0x7d   : > { %p612_p5 = scmp.lt.u32.totalorder %s610_s29, %s606_s9  ;;  %p614_p10 = scmp.lt.u32.totalorder %s606_s9, %s885_s27 }
  0x7e   : > { %p608_p6 = pnand %p607_p2, %p958_p11 }
  0x7f   : > { %p613_p8 = por %p612_p5, %p611_p4 }
  0x80   : > { %p609_p12 = pneg %p608_p6 }
  0x81   : > { %p615_p1 = por %p614_p10, %p613_p8 }
  0x83   : > { %p616_p0 = pnand %p615_p1, %p609_p12 }
  0x85   : > { %619 = shalt.err (!%p616_p0)
}
  0x86   : > { %462 = dma.vmem_to_hbm [thread:$0]  (%p958_p11), %s887_s6, 128, %s885_s27, %s310_s7  }
  0x87 PF: > { %s335_s23 = sand.u32 1, %s658_s12   ;;  %p959_p9 = scmp.ne.s32.totalorder %s948_s25, 0 }
  0x88   : > { %p960_p3 = scmp.ge.s32.totalorder %s678_s17, 2  ;;  %s336_s5 = scalar_lea.sflag [#allocation4], %s335_s23 }
  0x8a   : > { %p473_p7 = pnand %p960_p3, %p959_p9 }
  0x8c   : > { %653 = dma.done.wait (!%p473_p7), %s336_s5, 128  }
  0x8d   : > { %655 = vsyncadd (!%p473_p7), %s336_s5, 4294967168  ;;  %s20_s17 = sadd.s32 1, %s678_s17   ;;  %s961_s12 = smov %s662_s13 }
  0x8e   : > { %p17_p13 = scmp.ge.s32.totalorder %s20_s17, 4   ;;  %s962_s13 = smov %s666_s14 }
  0x8f   : > { %s963_s14 = smov %s824_s28  ;;  %s964_s15 = smov %s674_s16 }
  0x90   : > { %s965_s16 = smov %s967_s4  ;;  %19 = sbr.rel (!%p17_p13) target bundleno = 7 (0x7), region = 93 }
  0x97   :  { %341 = vsyncpa [#allocation3], 1 }
  0x98   :  { %343 = vsyncpa [#allocation3 + $0x1], 1 }
  0x99   :  { %344 = vsyncpa [#allocation6], 1 }
  0x9a   :  { %346 = vsyncpa [#allocation6 + $0x1], 1 }
  0x9b   :  { %347 = vsyncpa [#allocation4], 1 }
  0x9c   :  { %349 = vsyncpa [#allocation4 + $0x1], 1 }

</bundles_post_ra>
